<compile_context>
chip_gen: v5e
topology: v5e:2x2
jax: 0.10.0
libtpu: 0.0.40
codegen_flags: <defaults>
</compile_context>

<pallas_src>
import functools
import math

import numpy as np
import jax
import jax.numpy as jnp
from jax import lax
from jax.experimental import pallas as pl
from jax.experimental.pallas import tpu as pltpu


def _round_up(x, m):
    return ((x + m - 1) // m) * m


# Hash constants (all < 2**31 -> valid int32 literals; int32 wrap-around is fine).
_C_ROW = 0x1B873593
_C_COL = 0x19D699A5
_C_SEED = 0x2545F491
_C_MIX1 = 0x21F0AAAD
_C_MIX2 = 0x735A2D97


def _apply_dropout(emb, seed, base_row, col_offset, p_drop):
    """Inverted dropout on a vreg-resident block.

    Keep/drop bits come from a portable counter-hash PRNG keyed on
    (seed, global_row, global_col): deterministic given `seed`, runs on TPU and
    under interpret lowering.
    # TODO(synk): use pltpu.prng_random_bits on hardware once interpret parity
    #             is no longer required; this hash is not torch's RNG stream.
    """
    rows, cols = emb.shape
    r = base_row + lax.broadcasted_iota(jnp.int32, (rows, cols), 0)
    c = col_offset + lax.broadcasted_iota(jnp.int32, (rows, cols), 1)
    x = r * jnp.int32(_C_ROW) + c * jnp.int32(_C_COL) + seed * jnp.int32(_C_SEED)
    x = x ^ lax.shift_right_logical(x, 16)
    x = x * jnp.int32(_C_MIX1)
    x = x ^ lax.shift_right_logical(x, 15)
    x = x * jnp.int32(_C_MIX2)
    x = x ^ lax.shift_right_logical(x, 15)
    r31 = x & jnp.int32(0x7FFFFFFF)                       # uniform-ish in [0, 2^31)
    keep = r31 < jnp.int32(int((1.0 - p_drop) * 2147483648.0))
    scale = jnp.float32(1.0 / (1.0 - p_drop))
    return jnp.where(keep, emb * scale, jnp.float32(0.0))


def _embed_dropout_onehot_kernel(seed_ref, ids_ref, hi_ref, lo_ref, out_ref, *,
                                 p_drop, train, group, vocab_size, embed_dim):
    # seed_ref : (1,)            int32 SMEM (scalar prefetch)
    # ids_ref  : (rows, group)   int32 VMEM  (tile's token ids, grouped)
    # hi_ref   : (V, D)          bf16  VMEM  (table high bf16 plane, resident)
    # lo_ref   : (V, D)          bf16  VMEM  (table residual bf16 plane, resident)
    # out_ref  : (rows, group*D) f32   VMEM  (lane-dense output block)
    rows = out_ref.shape[0]
    base_row = pl.program_id(0) * rows

    ids = ids_ref[...]                                    # (rows, group)
    hi = hi_ref[...]
    lo = lo_ref[...]
    vocab_iota = lax.broadcasted_iota(jnp.int32, (rows, vocab_size), 1)

    for j in range(group):                                # static unroll, group <= 8
        onehot = (ids[:, j:j + 1] == vocab_iota).astype(jnp.bfloat16)   # (rows, V)
        # Exact 0/1 bf16 one-hot; hi+lo split keeps the lookup ~f32-accurate.
        emb = jnp.dot(onehot, hi, preferred_element_type=jnp.float32)
        emb = emb + jnp.dot(onehot, lo, preferred_element_type=jnp.float32)
        if train and 0.0 < p_drop < 1.0:
            emb = _apply_dropout(emb, seed_ref[0], base_row, j * embed_dim, p_drop)
        # Static-lane-offset store into the (lane-dense) output block; the HBM
        # writeback DMA is the full (rows, group*D) block -> unmasked.
        out_ref[:, j * embed_dim:(j + 1) * embed_dim] = emb.astype(out_ref.dtype)


def _embed_dropout_gather_kernel(seed_ref, ids_ref, table_ref, out_ref, emb_ref, *,
                                 p_drop, train, group, embed_dim):
    # Fallback for large vocabularies (no one-hot blow-up): dynamic row copies
    # from the VMEM-resident table into a grouped VMEM scratch, then fused
    # dropout + a single lane-dense store.
    # seed_ref : (1,)      int32 SMEM     ids_ref : (N_pad,) int32 SMEM
    # table_ref: (V, D)    f32   VMEM     out_ref : (rows, group*D) f32 VMEM
    # emb_ref  : (rows, group*D) f32 VMEM scratch
    rows = out_ref.shape[0]
    base_row = pl.program_id(0) * rows

    def gather(r, carry):
        for j in range(group):                            # static unroll
            tok = ids_ref[(base_row + r) * group + j]     # SMEM scalar
            emb_ref[pl.ds(r, 1), j * embed_dim:(j + 1) * embed_dim] = (
                table_ref[pl.ds(tok, 1), :])
        return carry

    lax.fori_loop(0, rows, gather, 0, unroll=8 if rows % 8 == 0 else 1)

    emb = emb_ref[...]
    if train and 0.0 < p_drop < 1.0:
        emb = _apply_dropout(emb, seed_ref[0], base_row, 0, p_drop)
    out_ref[...] = emb.astype(out_ref.dtype)


def word_embedding_forward(ids, table, seed, *, p_drop=0.3, train=True,
                           tile_rows=1024, onehot_max_vocab=1024):
    """ids: (B, S) int -> (B, S, D) f32, matching Embedding + Dropout(p)."""
    B, S = ids.shape
    V, D = table.shape
    N = B * S

    # Lane-dense grouping: pack g consecutive tokens per stored row so the
    # output block's last dim is a multiple of 128 (full-width vst / dense DMA).
    g = 1 if D % 128 == 0 else 128 // math.gcd(D, 128)
    if g > 8:                       # unusual D; not worth the unroll blow-up
        g = 1
    q = max(8 * g, 128)             # tile-row quantum (power of two)
    tile = _round_up(min(max(N, 1), tile_rows), q)
    n_pad = _round_up(N, tile)
    rows = tile // g                # output rows per grid step
    grid = (n_pad // tile,)

    # OOB policy: clamp (torch would raise).
    ids_flat = jnp.clip(ids.reshape(-1).astype(jnp.int32), 0, V - 1)
    if n_pad != N:
        ids_flat = jnp.pad(ids_flat, (0, n_pad - N))
    seed_arr = jnp.asarray([seed], dtype=jnp.int32)

    out_shape = jax.ShapeDtypeStruct((n_pad // g, g * D), table.dtype)

    table_bytes = V * D * 4
    work_bytes = 4 * tile * D * 4 + rows * max(V, 128) * 4 + tile * 8
    vmem_limit = int(min(max(table_bytes + work_bytes + (4 << 20), 32 << 20),
                         127 << 20))
    compiler_params = pltpu.CompilerParams(
        dimension_semantics=("parallel",),                # disjoint output tiles
        vmem_limit_bytes=vmem_limit)

    if V <= onehot_max_vocab:
        # --- one-hot MXU gather path (default / tested) -----------------------
        tbl = table.astype(jnp.float32)
        hi = tbl.astype(jnp.bfloat16)
        lo = (tbl - hi.astype(jnp.float32)).astype(jnp.bfloat16)
        ids_grp = ids_flat.reshape(n_pad // g, g)

        kernel = functools.partial(
            _embed_dropout_onehot_kernel, p_drop=float(p_drop), train=bool(train),
            group=g, vocab_size=V, embed_dim=D)

        out2d = pl.pallas_call(
            kernel,
            out_shape=out_shape,
            grid_spec=pltpu.PrefetchScalarGridSpec(
                num_scalar_prefetch=1,                    # seed -> SMEM
                grid=grid,
                in_specs=[
                    pl.BlockSpec((rows, g), lambda i, s: (i, 0)),
                    # Constant block index -> single-buffered resident table.
                    pl.BlockSpec((V, D), lambda i, s: (0, 0),
                                 pipeline_mode=pl.Buffered(1)),
                    pl.BlockSpec((V, D), lambda i, s: (0, 0),
                                 pipeline_mode=pl.Buffered(1)),
                ],
                out_specs=pl.BlockSpec((rows, g * D), lambda i, s: (i, 0)),
            ),
            compiler_params=compiler_params,
            cost_estimate=pl.CostEstimate(
                flops=4 * n_pad * V * D, transcendentals=0,
                bytes_accessed=n_pad * D * 4 + V * D * 4 + n_pad * 4),
        )(seed_arr, ids_grp, hi, lo)
    else:
        # --- large-vocab fallback: scalar-prefetched ids + VMEM row gather ----
        kernel = functools.partial(
            _embed_dropout_gather_kernel, p_drop=float(p_drop), train=bool(train),
            group=g, embed_dim=D)

        out2d = pl.pallas_call(
            kernel,
            out_shape=out_shape,
            grid_spec=pltpu.PrefetchScalarGridSpec(
                num_scalar_prefetch=2,                    # seed, ids -> SMEM
                grid=grid,
                in_specs=[
                    pl.BlockSpec((V, D), lambda i, s, t: (0, 0),
                                 pipeline_mode=pl.Buffered(1)),
                ],
                out_specs=pl.BlockSpec((rows, g * D), lambda i, s, t: (i, 0)),
                scratch_shapes=[pltpu.VMEM((rows, g * D), table.dtype)],
            ),
            compiler_params=compiler_params,
            cost_estimate=pl.CostEstimate(
                flops=0, transcendentals=0,
                bytes_accessed=n_pad * D * 4 + V * D * 4 + n_pad * 4),
        )(seed_arr, ids_flat, table.astype(jnp.float32))

    return out2d.reshape(n_pad, D)[:N].reshape(B, S, D)


if __name__ == "__main__":
    VOCAB_SIZE = 64
    EMBED_DIM = 32
    B, S = 2, 8
    P_DROP = 0.3

    key = jax.random.PRNGKey(0)
    k_table, k_ids = jax.random.split(key)

    # nn.Embedding default init: N(0, 1)
    table = jax.random.normal(k_table, (VOCAB_SIZE, EMBED_DIM), dtype=jnp.float32)
    ids = jax.random.randint(k_ids, (B, S), 0, VOCAB_SIZE, dtype=jnp.int32)
    ref = np.asarray(table)[np.asarray(ids)]

    # Eval mode (dropout off), one-hot MXU path: matches the gather to ~1e-5.
    out_eval = jax.block_until_ready(
        word_embedding_forward(ids, table, seed=0, p_drop=P_DROP, train=False))
    assert out_eval.shape == (B, S, EMBED_DIM) and out_eval.dtype == jnp.float32
    np.testing.assert_allclose(np.asarray(out_eval), ref, rtol=2e-4, atol=2e-4)

    # Eval mode, forced large-vocab fallback path: exact row copies.
    out_eval_fb = jax.block_until_ready(
        word_embedding_forward(ids, table, seed=0, p_drop=P_DROP, train=False,
                               onehot_max_vocab=0))
    np.testing.assert_allclose(np.asarray(out_eval_fb), ref, rtol=0, atol=0)

    # Train mode: kept elements equal table[id] / (1 - p); drop rate ~ p.
    out_tr = jax.block_until_ready(
        word_embedding_forward(ids, table, seed=1234, p_drop=P_DROP, train=True))
    out_np = np.asarray(out_tr)
    assert out_np.shape == (B, S, EMBED_DIM) and out_np.dtype == np.float32
    ref_scaled = ref / (1.0 - P_DROP)
    kept = out_np != 0.0
    np.testing.assert_allclose(out_np[kept], ref_scaled[kept], rtol=2e-4, atol=2e-4)
    drop_frac = float((~kept).mean())
    assert 0.10 < drop_frac < 0.50, drop_frac

    print("KERNEL_OK")
</pallas_src>

<mosaic_0001>
module attributes {stable_mosaic.version = 11 : i64} {
  func.func @_embed_dropout_onehot_kernel(%arg0: i32, %arg1: memref<1xi32, #tpu.memory_space<smem>>, %arg2: memref<32x4xi32, #tpu.memory_space<vmem>>, %arg3: memref<64x32xbf16, #tpu.memory_space<vmem>>, %arg4: memref<64x32xbf16, #tpu.memory_space<vmem>>, %arg5: memref<32x128xf32, #tpu.memory_space<vmem>>) attributes {dimension_semantics = [#tpu.dimension_semantics<parallel>], iteration_bounds = array<i64: 1>, scalar_prefetch = 1 : i64, scratch_operands = 0 : i64, tpu.core_type = #tpu.core_type<tc>, window_params = [{transform_indices = @transform_0, window_bounds = array<i64: 32, 4>}, {pipeline_mode = #tpu.pipeline_mode<synchronous>, transform_indices = @transform_1, window_bounds = array<i64: 64, 32>}, {pipeline_mode = #tpu.pipeline_mode<synchronous>, transform_indices = @transform_2, window_bounds = array<i64: 64, 32>}, {transform_indices = @transform_3, window_bounds = array<i64: 32, 128>}]} {
    %c0 = arith.constant 0 : index
    %c0_0 = arith.constant 0 : index
    %0 = vector.load %arg2[%c0, %c0_0] : memref<32x4xi32, #tpu.memory_space<vmem>>, vector<32x4xi32>
    %c0_1 = arith.constant 0 : index
    %c0_2 = arith.constant 0 : index
    %1 = vector.load %arg3[%c0_1, %c0_2] : memref<64x32xbf16, #tpu.memory_space<vmem>>, vector<64x32xbf16>
    %c0_3 = arith.constant 0 : index
    %c0_4 = arith.constant 0 : index
    %2 = vector.load %arg4[%c0_3, %c0_4] : memref<64x32xbf16, #tpu.memory_space<vmem>>, vector<64x32xbf16>
    %3 = tpu.iota {dimensions = array<i32: 1>} : vector<32x64xi32>
    %4 = vector.extract_strided_slice %0 {offsets = [0, 0], sizes = [32, 1], strides = [1, 1]} : vector<32x4xi32> to vector<32x1xi32>
    %5 = vector.broadcast %4 : vector<32x1xi32> to vector<32x64xi32>
    %6 = arith.cmpi eq, %5, %3 : vector<32x64xi32>
    %7 = arith.extui %6 : vector<32x64xi1> to vector<32x64xi32>
    %8 = arith.sitofp %7 : vector<32x64xi32> to vector<32x64xf32>
    %9 = arith.truncf %8 : vector<32x64xf32> to vector<32x64xbf16>
    %cst = arith.constant dense<0.000000e+00> : vector<32x32xf32>
    %10 = tpu.matmul %9, %1, %cst {dimension_numbers = #tpu.dot_dimension_numbers<[1], [0], [0], [1], [0, 0, 1, 1], [], []>} : vector<32x64xbf16>, vector<64x32xbf16>, vector<32x32xf32> -> vector<32x32xf32>
    %cst_5 = arith.constant dense<0.000000e+00> : vector<32x32xf32>
    %11 = tpu.matmul %9, %2, %cst_5 {dimension_numbers = #tpu.dot_dimension_numbers<[1], [0], [0], [1], [0, 0, 1, 1], [], []>} : vector<32x64xbf16>, vector<64x32xbf16>, vector<32x32xf32> -> vector<32x32xf32>
    %12 = arith.addf %10, %11 : vector<32x32xf32>
    %c0_6 = arith.constant 0 : index
    %c0_7 = arith.constant 0 : index
    %13 = vector.load %arg5[%c0_6, %c0_7] : memref<32x128xf32, #tpu.memory_space<vmem>>, vector<32x32xf32>
    tpu.vector_store %arg5[%c0_6, %c0_7], %12 {strides = array<i32>} : memref<32x128xf32, #tpu.memory_space<vmem>>, vector<32x32xf32>,
    %14 = vector.extract_strided_slice %0 {offsets = [0, 1], sizes = [32, 1], strides = [1, 1]} : vector<32x4xi32> to vector<32x1xi32>
    %15 = vector.broadcast %14 : vector<32x1xi32> to vector<32x64xi32>
    %16 = arith.cmpi eq, %15, %3 : vector<32x64xi32>
    %17 = arith.extui %16 : vector<32x64xi1> to vector<32x64xi32>
    %18 = arith.sitofp %17 : vector<32x64xi32> to vector<32x64xf32>
    %19 = arith.truncf %18 : vector<32x64xf32> to vector<32x64xbf16>
    %cst_8 = arith.constant dense<0.000000e+00> : vector<32x32xf32>
    %20 = tpu.matmul %19, %1, %cst_8 {dimension_numbers = #tpu.dot_dimension_numbers<[1], [0], [0], [1], [0, 0, 1, 1], [], []>} : vector<32x64xbf16>, vector<64x32xbf16>, vector<32x32xf32> -> vector<32x32xf32>
    %cst_9 = arith.constant dense<0.000000e+00> : vector<32x32xf32>
    %21 = tpu.matmul %19, %2, %cst_9 {dimension_numbers = #tpu.dot_dimension_numbers<[1], [0], [0], [1], [0, 0, 1, 1], [], []>} : vector<32x64xbf16>, vector<64x32xbf16>, vector<32x32xf32> -> vector<32x32xf32>
    %22 = arith.addf %20, %21 : vector<32x32xf32>
    %c0_10 = arith.constant 0 : index
    %c32 = arith.constant 32 : index
    %23 = vector.load %arg5[%c0_10, %c32] : memref<32x128xf32, #tpu.memory_space<vmem>>, vector<32x32xf32>
    tpu.vector_store %arg5[%c0_10, %c32], %22 {strides = array<i32>} : memref<32x128xf32, #tpu.memory_space<vmem>>, vector<32x32xf32>,
    %24 = vector.extract_strided_slice %0 {offsets = [0, 2], sizes = [32, 1], strides = [1, 1]} : vector<32x4xi32> to vector<32x1xi32>
    %25 = vector.broadcast %24 : vector<32x1xi32> to vector<32x64xi32>
    %26 = arith.cmpi eq, %25, %3 : vector<32x64xi32>
    %27 = arith.extui %26 : vector<32x64xi1> to vector<32x64xi32>
    %28 = arith.sitofp %27 : vector<32x64xi32> to vector<32x64xf32>
    %29 = arith.truncf %28 : vector<32x64xf32> to vector<32x64xbf16>
    %cst_11 = arith.constant dense<0.000000e+00> : vector<32x32xf32>
    %30 = tpu.matmul %29, %1, %cst_11 {dimension_numbers = #tpu.dot_dimension_numbers<[1], [0], [0], [1], [0, 0, 1, 1], [], []>} : vector<32x64xbf16>, vector<64x32xbf16>, vector<32x32xf32> -> vector<32x32xf32>
    %cst_12 = arith.constant dense<0.000000e+00> : vector<32x32xf32>
    %31 = tpu.matmul %29, %2, %cst_12 {dimension_numbers = #tpu.dot_dimension_numbers<[1], [0], [0], [1], [0, 0, 1, 1], [], []>} : vector<32x64xbf16>, vector<64x32xbf16>, vector<32x32xf32> -> vector<32x32xf32>
    %32 = arith.addf %30, %31 : vector<32x32xf32>
    %c0_13 = arith.constant 0 : index
    %c64 = arith.constant 64 : index
    %33 = vector.load %arg5[%c0_13, %c64] : memref<32x128xf32, #tpu.memory_space<vmem>>, vector<32x32xf32>
    tpu.vector_store %arg5[%c0_13, %c64], %32 {strides = array<i32>} : memref<32x128xf32, #tpu.memory_space<vmem>>, vector<32x32xf32>,
    %34 = vector.extract_strided_slice %0 {offsets = [0, 3], sizes = [32, 1], strides = [1, 1]} : vector<32x4xi32> to vector<32x1xi32>
    %35 = vector.broadcast %34 : vector<32x1xi32> to vector<32x64xi32>
    %36 = arith.cmpi eq, %35, %3 : vector<32x64xi32>
    %37 = arith.extui %36 : vector<32x64xi1> to vector<32x64xi32>
    %38 = arith.sitofp %37 : vector<32x64xi32> to vector<32x64xf32>
    %39 = arith.truncf %38 : vector<32x64xf32> to vector<32x64xbf16>
    %cst_14 = arith.constant dense<0.000000e+00> : vector<32x32xf32>
    %40 = tpu.matmul %39, %1, %cst_14 {dimension_numbers = #tpu.dot_dimension_numbers<[1], [0], [0], [1], [0, 0, 1, 1], [], []>} : vector<32x64xbf16>, vector<64x32xbf16>, vector<32x32xf32> -> vector<32x32xf32>
    %cst_15 = arith.constant dense<0.000000e+00> : vector<32x32xf32>
    %41 = tpu.matmul %39, %2, %cst_15 {dimension_numbers = #tpu.dot_dimension_numbers<[1], [0], [0], [1], [0, 0, 1, 1], [], []>} : vector<32x64xbf16>, vector<64x32xbf16>, vector<32x32xf32> -> vector<32x32xf32>
    %42 = arith.addf %40, %41 : vector<32x32xf32>
    %c0_16 = arith.constant 0 : index
    %c96 = arith.constant 96 : index
    %43 = vector.load %arg5[%c0_16, %c96] : memref<32x128xf32, #tpu.memory_space<vmem>>, vector<32x32xf32>
    tpu.vector_store %arg5[%c0_16, %c96], %42 {strides = array<i32>} : memref<32x128xf32, #tpu.memory_space<vmem>>, vector<32x32xf32>,
    return
  }
  func.func @transform_0(%arg0: i32, %arg1: memref<1xi32, #tpu.memory_space<smem>>) -> (i32, i32) {
    %c0_i32 = arith.constant 0 : i32
    %c0_i32_0 = arith.constant 0 : i32
    return %arg0, %c0_i32 : i32, i32
  }
  func.func @transform_1(%arg0: i32, %arg1: memref<1xi32, #tpu.memory_space<smem>>) -> (i32, i32) {
    %c0_i32 = arith.constant 0 : i32
    %c0_i32_0 = arith.constant 0 : i32
    %c0_i32_1 = arith.constant 0 : i32
    return %c0_i32, %c0_i32_0 : i32, i32
  }
  func.func @transform_2(%arg0: i32, %arg1: memref<1xi32, #tpu.memory_space<smem>>) -> (i32, i32) {
    %c0_i32 = arith.constant 0 : i32
    %c0_i32_0 = arith.constant 0 : i32
    %c0_i32_1 = arith.constant 0 : i32
    return %c0_i32, %c0_i32_0 : i32, i32
  }
  func.func @transform_3(%arg0: i32, %arg1: memref<1xi32, #tpu.memory_space<smem>>) -> (i32, i32) {
    %c0_i32 = arith.constant 0 : i32
    %c0_i32_0 = arith.constant 0 : i32
    return %arg0, %c0_i32 : i32, i32
  }
}

</mosaic_0001>

<bundles_post_ra>
// kernel: tpu_custom_call.1
= control target key start
LH: loop header
LB: loop body
LE: loop exit
PB: predicated region body
PF: predicated region fallthrough
CT: control target
= control target key end

     0   :  { %v576_v1 = vmov 1   ;;  %v577_v2 = vmov 0   ;;  %s693_s0 = inlined_call_operand.<no memory space> [shape: s32[1], index: 0, kind: input, shape index: {}]   ;;  %s694_s1 = inlined_call_operand.vmem [shape: s32[32,4], index: 1, kind: input, shape index: {}]   ;;  %s695_s2 = inlined_call_operand.vmem [shape: bf16[64,32], index: 2, kind: input, shape index: {}]   ;;  %s696_s3 = inlined_call_operand.vmem [shape: bf16[64,32], index: 3, kind: input, shape index: {}]   ;;  %s697_s4 = inlined_call_operand.hbm [shape: f32[32,128], index: 4, kind: output, shape index: {}]  }
   0x1   :  { %v18_v0 = vld [vmem:[%s694_s1] sm:$0xff]  ;;  %538 = vset.pattern.permute.xlu0 %v576_v1  ;;  %539 = vset.pattern.permute.xlu1 %v577_v2 }
   0x2   :  { %10 = vsyncpa [#allocation5], 0  ;;  %41 = vperm.xlu1 %539, %v18_v0   ;;  %165 = vperm.xlu0 %538, %v18_v0   ;;  %v20_v3 = vld [vmem:[%s694_s1 + $0x10] sm:$0xff]  ;;  %v19_v4 = vld [vmem:[%s694_s1 + $0x8] sm:$0xff]  ;;  %v578_v8 = vmov 3   ;;  %v579_v9 = vmov 2   ;;  %v38_v16 = vlaneseq }
   0x3   :  { %540 = vset.pattern.permute.xlu2 %v576_v1  ;;  %v21_v5 = vld [vmem:[%s694_s1 + $0x18] sm:$0xff]  ;;  %v525_v10 = vld [vmem:[%s696_s3 + $0x10] sm:$0xff]  ;;  %v524_v12 = vld [vmem:[%s696_s3 + $0x8] sm:$0xff]  ;;  %v580_v21 = vmov 0.0   ;;  %vm90_vm4 = vcmask 523264   ;;  %s583_s11 = smov 96  }
   0x4   :  { %171 = vperm.xlu2 %540, %v20_v3   ;;  %v526_v6 = vld [vmem:[%s696_s3 + $0x18] sm:$0xff]  ;;  %v521_v11 = vld [vmem:[%s695_s2 + $0x10] sm:$0xff]  ;;  %v520_v13 = vld [vmem:[%s695_s2 + $0x8] sm:$0xff]  ;;  %v648_v20 = vand.u32 127, %v38_v16  ;;  %s584_s12 = smov [#allocation4]   ;;  %s443_s16 = sshll.u32 %s697_s4, 4  ;;  %s444_s16 = int_to_ptr.hbm [resolvable:$true] %s443_s16 }
   0x5   :  { %v522_v7 = vld [vmem:[%s695_s2 + $0x18] sm:$0xff]  ;;  %101 = vmatpush.bf16.msra.mxu0 %v526_v6  ;;  %200 = vmatpush.bf16.msra.mxu2 %v526_v6  ;;  %v523_v14 = vld [vmem:[%s696_s3] sm:$0xff]  ;;  %s582_s3 = smov 64   ;;  %s441_s13 = sshll.u32 %s584_s12, 4  ;;  %s442_s13 = int_to_ptr.vmem [resolvable:$true] %s441_s13 }
   0x6   :  { %144 = vmatpush.bf16.msra.mxu1 %v522_v7  ;;  %219 = vmatpush.bf16.msra.mxu3 %v522_v7  ;;  %v519_v15 = vld [vmem:[%s695_s2] sm:$0xff]  ;;  %s581_s2 = smov 32   ;;  %s585_s0 = smov 128  }
   0x7   :  { %s586_s17 = smov 8  }
   0x9   :  { %102 = vmatpush.bf16.msra.mxu0 %v525_v10  ;;  %201 = vmatpush.bf16.msra.mxu2 %v525_v10 }
   0xa   :  { %44 = vperm.xlu1 %539, %v19_v4   ;;  %168 = vperm.xlu0 %538, %v19_v4  }
   0xb   :  { %145 = vmatpush.bf16.msra.mxu1 %v521_v11  ;;  %220 = vmatpush.bf16.msra.mxu3 %v521_v11 }
   0xc   :  { %174 = vperm.xlu2 %540, %v21_v5  }
   0xd   :  { %103 = vmatpush.bf16.msra.mxu0 %v524_v12  ;;  %202 = vmatpush.bf16.msra.mxu2 %v524_v12 }
   0xf   :  { %146 = vmatpush.bf16.msra.mxu1 %v520_v13  ;;  %221 = vmatpush.bf16.msra.mxu3 %v520_v13 }
  0x11   :  { %104 = vmatpush.bf16.msra.mxu0 %v523_v14  ;;  %203 = vmatpush.bf16.msra.mxu2 %v523_v14 }
  0x12   :  { %50 = vperm.xlu1 %539, %v21_v5   ;;  %541 = vset.pattern.permute.xlu0 %v577_v2 }
  0x13   :  { %47 = vperm.xlu0 %541, %v20_v3   ;;  %147 = vmatpush.bf16.msra.mxu1 %v519_v15 }
  0x14   :  { %542 = vset.pattern.permute.xlu2 %v578_v8  ;;  %222 = vmatpush.bf16.msra.mxu3 %v519_v15 }
  0x15   :  { %347 = vperm.xlu2 %542, %v18_v0   ;;  %291 = vmatpush.bf16.msrb.mxu0 %v526_v6 }
  0x16   :  { %382 = vmatpush.bf16.msrb.mxu2 %v526_v6 }
  0x17   :  { %310 = vmatpush.bf16.msrb.mxu1 %v522_v7 }
  0x18   :  { %401 = vmatpush.bf16.msrb.mxu3 %v522_v7 }
  0x19   :  { %292 = vmatpush.bf16.msrb.mxu0 %v525_v10 }
  0x1a   :  { %543 = vset.pattern.permute.xlu1 %v578_v8  ;;  %383 = vmatpush.bf16.msrb.mxu2 %v525_v10 }
  0x1b   :  { %350 = vperm.xlu1 %543, %v19_v4   ;;  %545 = vset.pattern.permute.xlu0 %v579_v9 }
  0x1c   :  { %259 = vperm.xlu0 %545, %v19_v4   ;;  %311 = vmatpush.bf16.msrb.mxu1 %v521_v11 }
  0x1d   :  { %544 = vset.pattern.permute.xlu2 %v579_v9  ;;  %402 = vmatpush.bf16.msrb.mxu3 %v521_v11 }
  0x1e   :  { %256 = vperm.xlu2 %544, %v18_v0   ;;  %293 = vmatpush.bf16.msrb.mxu0 %v524_v12 }
  0x1f   :  { %384 = vmatpush.bf16.msrb.mxu2 %v524_v12 }
  0x20   :  { %312 = vmatpush.bf16.msrb.mxu1 %v520_v13 }
  0x21   :  { %403 = vmatpush.bf16.msrb.mxu3 %v520_v13 }
  0x22   :  { %294 = vmatpush.bf16.msrb.mxu0 %v523_v14 }
  0x23   :  { %353 = vperm.xlu1 %543, %v20_v3   ;;  %385 = vmatpush.bf16.msrb.mxu2 %v523_v14 }
  0x24   :  { %549 = vset.pattern.permute.xlu0 %v578_v8  ;;  %313 = vmatpush.bf16.msrb.mxu1 %v519_v15 }
  0x25   :  { %404 = vmatpush.bf16.msrb.mxu3 %v519_v15 }
  0x26   :  { %546 = vset.pattern.permute.xlu2 %v578_v8 }
  0x27   :  { %356 = vperm.xlu2 %546, %v21_v5  }
  0x2b   :  { %547 = vset.pattern.permute.xlu1 %v579_v9 }
  0x2c   :  { %262 = vperm.xlu1 %547, %v20_v3  }
  0x2f   :  { %548 = vset.pattern.permute.xlu2 %v579_v9 }
  0x30   :  { %265 = vperm.xlu2 %548, %v21_v5  }
  0x5e   :  { %v172_v19 = vpop.permute.xlu2 %171 }
  0x5f   :  { %vm178_vm7 = vcmp.eq.s32.totalorder %v172_v19, %v648_v20 }
  0x60   :  { %v497_v36 = vsel %vm178_vm7, 1.0, %v580_v21 }
  0x66   :  { %v175_v30 = vpop.permute.xlu2 %174 }
  0x67   :  { %vm179_vm8 = vcmp.eq.s32.totalorder %v175_v30, %v648_v20 }
  0x68   :  { %v498_v37 = vsel %vm179_vm8, 1.0, %v580_v21 }
  0x69   :  { %v189_v39 = vpack.c.bf16 %v498_v37, %v497_v36 }
  0x6f   :  { %v348_v33 = vpop.permute.xlu2 %347 }
  0x70   :  { %vm358_vm11 = vcmp.eq.s32.totalorder %v348_v33, %v648_v20 }
  0x71   :  { %v511_v47 = vsel %vm358_vm11, 1.0, %v580_v21 }
  0x74   :  { %v42_v17 = vpop.permute.xlu1 %41  ;;  %v166_v18 = vpop.permute.xlu0 %165 }
  0x75   :  { %vm176_vm0 = vcmp.eq.s32.totalorder %v166_v18, %v648_v20  ;;  %vm52_vm1 = vcmp.eq.s32.totalorder %v42_v17, %v648_v20 }
  0x76   :  { %v495_v22 = vsel %vm176_vm0, 1.0, %v580_v21  ;;  %v455_v25 = vsel %vm52_vm1, 1.0, %v580_v21  ;;  %vm159_vm1 = vcmask 261120  }
  0x78   :  { %v257_v40 = vpop.permute.xlu2 %256 }
  0x79   :  { %vm267_vm9 = vcmp.eq.s32.totalorder %v257_v40, %v648_v20 }
  0x7a   :  { %v503_v43 = vsel %vm267_vm9, 1.0, %v580_v21 }
  0x7c   :  { %v45_v23 = vpop.permute.xlu1 %44  ;;  %v169_v24 = vpop.permute.xlu0 %168 }
  0x7d   :  { %vm53_vm2 = vcmp.eq.s32.totalorder %v45_v23, %v648_v20  ;;  %vm177_vm3 = vcmp.eq.s32.totalorder %v169_v24, %v648_v20 }
  0x7e   :  { %v456_v26 = vsel %vm53_vm2, 1.0, %v580_v21  ;;  %v496_v27 = vsel %vm177_vm3, 1.0, %v580_v21  ;;  %vm250_vm2 = vcmask 523520   ;;  %vm341_vm3 = vcmask 785920  }
  0x7f   :  { %v64_v28 = vpack.c.bf16 %v456_v26, %v455_v25  ;;  %v188_v29 = vpack.c.bf16 %v496_v27, %v495_v22 }
  0x81   :  { %475 = vmatmul.msk.bf16.vlgmr.msra.gmra.mxu0 %vm90_vm4, %v64_v28  ;;  %493 = vmatmul.msk.bf16.vlgmr.msra.gmra.mxu1 %vm90_vm4, %v64_v28  ;;  %v357_v45 = vpop.permute.xlu2 %356 }
  0x82   :  { %499 = vmatmul.msk.bf16.vlgmr.msra.gmra.mxu2 %vm90_vm4, %v188_v29  ;;  %501 = vmatmul.msk.bf16.vlgmr.msra.gmra.mxu3 %vm90_vm4, %v188_v29  ;;  %vm361_vm15 = vcmp.eq.s32.totalorder %v357_v45, %v648_v20 }
  0x83   :  { %v514_v55 = vsel %vm361_vm15, 1.0, %v580_v21 }
  0x84   :  { %v51_v31 = vpop.permute.xlu1 %50 }
  0x85   :  { %v48_v32 = vpop.permute.xlu0 %47  ;;  %vm55_vm5 = vcmp.eq.s32.totalorder %v51_v31, %v648_v20 }
  0x86   :  { %vm54_vm6 = vcmp.eq.s32.totalorder %v48_v32, %v648_v20  ;;  %v458_v34 = vsel %vm55_vm5, 1.0, %v580_v21 }
  0x87   :  { %v457_v35 = vsel %vm54_vm6, 1.0, %v580_v21 }
  0x88   :  { %v65_v38 = vpack.c.bf16 %v458_v34, %v457_v35 }
  0x8a   :  { %v266_v51 = vpop.permute.xlu2 %265 }
  0x8b   :  { %vm270_vm13 = vcmp.eq.s32.totalorder %v266_v51, %v648_v20 }
  0x8c   :  { %v506_v53 = vsel %vm270_vm13, 1.0, %v580_v21 }
  0x8d   :  { %v351_v41 = vpop.permute.xlu1 %350 }
  0x8e   :  { %v260_v42 = vpop.permute.xlu0 %259  ;;  %vm359_vm12 = vcmp.eq.s32.totalorder %v351_v41, %v648_v20 }
  0x8f   :  { %vm268_vm10 = vcmp.eq.s32.totalorder %v260_v42, %v648_v20  ;;  %v512_v48 = vsel %vm359_vm12, 1.0, %v580_v21 }
  0x90   :  { %v504_v44 = vsel %vm268_vm10, 1.0, %v580_v21  ;;  %v370_v50 = vpack.c.bf16 %v512_v48, %v511_v47 }
  0x91   :  { %476 = vmatmul.msk.bf16.gmra.mxu0 %vm90_vm4, %v65_v38  ;;  %494 = vmatmul.msk.bf16.gmra.mxu1 %vm90_vm4, %v65_v38  ;;  %v279_v49 = vpack.c.bf16 %v504_v44, %v503_v43 }
  0x92   :  { %500 = vmatmul.msk.bf16.gmra.mxu2 %vm90_vm4, %v189_v39  ;;  %502 = vmatmul.msk.bf16.gmra.mxu3 %vm90_vm4, %v189_v39 }
  0x95   :  { %v354_v46 = vpop.permute.xlu1 %353 }
  0x96   :  { %vm360_vm0 = vcmp.eq.s32.totalorder %v354_v46, %v648_v20 }
  0x97   :  { %v513_v56 = vsel %vm360_vm0, 1.0, %v580_v21 }
  0x98   :  { %v371_v58 = vpack.c.bf16 %v514_v55, %v513_v56 }
  0x9e   :  { %v263_v52 = vpop.permute.xlu1 %262 }
  0x9f   :  { %vm269_vm14 = vcmp.eq.s32.totalorder %v263_v52, %v648_v20 }
  0xa0   :  { %v505_v54 = vsel %vm269_vm14, 1.0, %v580_v21 }
  0xa1   :  { %507 = vmatmul.msk.bf16.vlgmr.msrb.gmra.mxu0 %vm90_vm4, %v279_v49  ;;  %509 = vmatmul.msk.bf16.vlgmr.msrb.gmra.mxu1 %vm90_vm4, %v279_v49  ;;  %v280_v57 = vpack.c.bf16 %v506_v53, %v505_v54 }
  0xa2   :  { %515 = vmatmul.msk.bf16.vlgmr.msrb.gmra.mxu2 %vm90_vm4, %v370_v50  ;;  %517 = vmatmul.msk.bf16.vlgmr.msrb.gmra.mxu3 %vm90_vm4, %v370_v50 }
  0xb1   :  { %508 = vmatmul.msk.bf16.gmra.mxu0 %vm90_vm4, %v280_v57  ;;  %510 = vmatmul.msk.bf16.gmra.mxu1 %vm90_vm4, %v280_v57 }
  0xb2   :  { %516 = vmatmul.msk.bf16.gmra.mxu2 %vm90_vm4, %v371_v58  ;;  %518 = vmatmul.msk.bf16.gmra.mxu3 %vm90_vm4, %v371_v58  ;;  %vm432_vm4 = vcmask 1048320  }
  0xfe   :  { %v106_v59 = vpop.f32.mrf.mxu0  ;;  %v149_v60 = vpop.f32.mrf.mxu1 }
  0xff   :  { %v150_v61 = vadd.f32 %v149_v60, %v106_v59 }
 0x101   :  { %160 = vst.msk [vmem:[#allocation4] sm:$0xff] %vm159_vm1, %v150_v61 }
 0x105   :  { %v205_v62 = vpop.f32.mrf.mxu2  ;;  %v224_v63 = vpop.f32.mrf.mxu3 }
 0x106   :  { %v225_v0 = vadd.f32 %v224_v63, %v205_v62  ;;  %v108_v1 = vpop.f32.mrf.mxu0  ;;  %v151_v2 = vpop.f32.mrf.mxu1 }
 0x107   :  { %v152_v3 = vadd.f32 %v151_v2, %v108_v1 }
 0x108   :  { %238 = vrot.lane.b32.xlu0 %v225_v0, %s581_s2 }
 0x109   :  { %161 = vst.msk [vmem:[#allocation4 + $0x8] sm:$0xff] %vm159_vm1, %v152_v3 }
 0x10d   :  { %v207_v4 = vpop.f32.mrf.mxu2  ;;  %v226_v5 = vpop.f32.mrf.mxu3 }
 0x10e   :  { %v227_v6 = vadd.f32 %v226_v5, %v207_v4  ;;  %v111_v7 = vpop.f32.mrf.mxu0  ;;  %v154_v8 = vpop.f32.mrf.mxu1 }
 0x10f   :  { %v155_v9 = vadd.f32 %v154_v8, %v111_v7 }
 0x110   :  { %240 = vrot.lane.b32.xlu1 %v227_v6, %s581_s2 }
 0x111   :  { %162 = vst.msk [vmem:[#allocation4 + $0x10] sm:$0xff] %vm159_vm1, %v155_v9 }
 0x115   :  { %v210_v10 = vpop.f32.mrf.mxu2  ;;  %v229_v11 = vpop.f32.mrf.mxu3 }
 0x116   :  { %v230_v12 = vadd.f32 %v229_v11, %v210_v10  ;;  %v113_v13 = vpop.f32.mrf.mxu0  ;;  %v156_v14 = vpop.f32.mrf.mxu1 }
 0x117   :  { %v157_v15 = vadd.f32 %v156_v14, %v113_v13 }
 0x118   :  { %242 = vrot.lane.b32.xlu2 %v230_v12, %s581_s2 }
 0x119   :  { %163 = vst.msk [vmem:[#allocation4 + $0x18] sm:$0xff] %vm159_vm1, %v157_v15 }
 0x11d   :  { %v212_v16 = vpop.f32.mrf.mxu2  ;;  %v231_v17 = vpop.f32.mrf.mxu3 }
 0x11e   :  { %v232_v18 = vadd.f32 %v231_v17, %v212_v16  ;;  %v296_v19 = vpop.f32.mrf.mxu0  ;;  %v315_v20 = vpop.f32.mrf.mxu1 }
 0x11f   :  { %v316_v21 = vadd.f32 %v315_v20, %v296_v19 }
 0x120   :  { %244 = vrot.lane.b32.xlu0 %v232_v18, %s581_s2 }
 0x121   :  { %329 = vrot.lane.b32.xlu1 %v316_v21, %s582_s3 }
 0x125   :  { %v387_v22 = vpop.f32.mrf.mxu2  ;;  %v406_v23 = vpop.f32.mrf.mxu3 }
 0x126   :  { %v407_v24 = vadd.f32 %v406_v23, %v387_v22  ;;  %v298_v25 = vpop.f32.mrf.mxu0  ;;  %v317_v26 = vpop.f32.mrf.mxu1 }
 0x127   :  { %v318_v29 = vadd.f32 %v317_v26, %v298_v25 }
 0x128   :  { %420 = vrot.lane.b32.xlu2 %v407_v24, %s583_s11 }
 0x12d   :  { %v389_v27 = vpop.f32.mrf.mxu2  ;;  %v408_v28 = vpop.f32.mrf.mxu3 }
 0x12e   :  { %v301_v30 = vpop.f32.mrf.mxu0  ;;  %v320_v31 = vpop.f32.mrf.mxu1  ;;  %v409_v37 = vadd.f32 %v408_v28, %v389_v27 }
 0x12f   :  { %v321_v32 = vadd.f32 %v320_v31, %v301_v30 }
 0x130   :  { %331 = vrot.lane.b32.xlu2 %v318_v29, %s582_s3 }
 0x131   :  { %333 = vrot.lane.b32.xlu0 %v321_v32, %s582_s3 }
 0x135   :  { %v392_v33 = vpop.f32.mrf.mxu2  ;;  %v411_v34 = vpop.f32.mrf.mxu3 }
 0x136   :  { %v303_v35 = vpop.f32.mrf.mxu0  ;;  %v322_v36 = vpop.f32.mrf.mxu1  ;;  %v412_v42 = vadd.f32 %v411_v34, %v392_v33 }
 0x137   :  { %v323_v38 = vadd.f32 %v322_v36, %v303_v35 }
 0x139   :  { %422 = vrot.lane.b32.xlu0 %v409_v37, %s583_s11  ;;  %335 = vrot.lane.b32.xlu1 %v323_v38, %s582_s3 }
 0x13d   :  { %v394_v39 = vpop.f32.mrf.mxu2  ;;  %v413_v40 = vpop.f32.mrf.mxu3 }
 0x13e   :  { %v414_v41 = vadd.f32 %v413_v40, %v394_v39 }
 0x140   :  { %426 = vrot.lane.b32.xlu2 %v414_v41, %s583_s11 }
 0x141   :  { %424 = vrot.lane.b32.xlu1 %v412_v42, %s583_s11 }
 0x172   :  { %v243_v43 = vpop.permute.xlu2 %242 }
 0x173   :  { %253 = vst.msk [vmem:[#allocation4 + $0x10] sm:$0xff] %vm250_vm2, %v243_v43 }
 0x17a   :  { %v239_v44 = vpop.permute.xlu0 %238 }
 0x17b   :  { %251 = vst.msk [vmem:[#allocation4] sm:$0xff] %vm250_vm2, %v239_v44 }
 0x182   :  { %v241_v45 = vpop.permute.xlu1 %240  ;;  %v421_v46 = vpop.permute.xlu2 %420 }
 0x183   :  { %252 = vst.msk [vmem:[#allocation4 + $0x8] sm:$0xff] %vm250_vm2, %v241_v45 }
 0x18a   :  { %v332_v47 = vpop.permute.xlu2 %331 }
 0x18b   :  { %343 = vst.msk [vmem:[#allocation4 + $0x8] sm:$0xff] %vm341_vm3, %v332_v47 }
 0x192   :  { %v245_v48 = vpop.permute.xlu0 %244 }
 0x193   :  { %254 = vst.msk [vmem:[#allocation4 + $0x18] sm:$0xff] %vm250_vm2, %v245_v48  ;;  %v330_v49 = vpop.permute.xlu1 %329 }
 0x194   :  { %342 = vst.msk [vmem:[#allocation4] sm:$0xff] %vm341_vm3, %v330_v49 }
 0x195   :  { %433 = vst.msk [vmem:[#allocation4] sm:$0xff] %vm432_vm4, %v421_v46 }
 0x19a   :  { %v427_v53 = vpop.permute.xlu2 %426 }
 0x1a3   :  { %v334_v50 = vpop.permute.xlu0 %333 }
 0x1a4   :  { %344 = vst.msk [vmem:[#allocation4 + $0x10] sm:$0xff] %vm341_vm3, %v334_v50 }
 0x1ab   :  { %v336_v51 = vpop.permute.xlu1 %335  ;;  %v423_v52 = vpop.permute.xlu0 %422 }
 0x1ac   :  { %345 = vst.msk [vmem:[#allocation4 + $0x18] sm:$0xff] %vm341_vm3, %v336_v51 }
 0x1ad   :  { %436 = vst.msk [vmem:[#allocation4 + $0x18] sm:$0xff] %vm432_vm4, %v427_v53 }
 0x1ae   :  { %434 = vst.msk [vmem:[#allocation4 + $0x8] sm:$0xff] %vm432_vm4, %v423_v52 }
 0x1b3   :  { %v425_v54 = vpop.permute.xlu1 %424 }
 0x1b4   :  { %435 = vst.msk [vmem:[#allocation4 + $0x10] sm:$0xff] %vm432_vm4, %v425_v54 }
 0x1b5   :  { %449 = dma.vmem_to_hbm [thread:$0]  %s442_s13, 512, %s444_s16, [#allocation5], %s585_s0, %s585_s0, %s586_s17  }
 0x1b6   :  { %574 = dma.done.wait [#allocation5], 512  }
 0x1b7   :  { %575 = vsyncadd [#allocation5], 4294966784 }
 0x1b8   :  { %454 = vsyncpa [#allocation5], 1 }

</bundles_post_ra>
